<compile_context>
chip_gen: v7x
topology: tpu7x:2x2x1
jax: 0.10.0
libtpu: 0.0.40
codegen_flags: <defaults>
</compile_context>

<pallas_src>
import jax
import jax.numpy as jnp
from jax.experimental import pallas as pl
from jax.experimental.pallas import tpu as pltpu


def _rnn_kernel(x_ref, h1_in_ref, h2_in_ref,
                w_ih1_ref, w_hh1_ref, b1_ref,
                w_ih2_ref, w_hh2_ref, b2_ref,
                w_fc_ref, b_fc_ref,
                out_ref, h1_out_ref, h2_out_ref):
    T, B, D = x_ref.shape
    H = h1_in_ref.shape[1]

    x = x_ref[...].astype(jnp.float32)              # (T, B, D)  -- T-major
    w_ih1 = w_ih1_ref[...]                          # (D, H)
    w_hh1 = w_hh1_ref[...]                          # (H, H)
    w_ih2 = w_ih2_ref[...]                          # (H, H)
    w_hh2 = w_hh2_ref[...]                          # (H, H)
    w_fc = w_fc_ref[...]                            # (H, D)

    # Time-invariant input projection for cell 1, batched over all T steps,
    # with the cell-1 bias folded in once (hoisted out of the recurrence).
    xw = jnp.dot(x.reshape(T * B, D), w_ih1,
                 preferred_element_type=jnp.float32).reshape(T, B, H)
    xw = xw + b1_ref[...]                           # (T, B, H)

    # Hoist the cell-2 bias broadcast out of the unrolled time loop.
    b2 = jnp.broadcast_to(b2_ref[...], (B, H))      # (B, H)

    h1 = h1_in_ref[...].astype(jnp.float32)         # (B, H)
    h2 = h2_in_ref[...].astype(jnp.float32)         # (B, H)

    # TODO(synk): for large T switch this fully-unrolled loop to lax.fori_loop with a
    # (T, B, H) VMEM scratch to bound vreg live ranges / compile time.
    h2_steps = []
    for t in range(T):  # static, small T -> fully unrolled; h1/h2 stay in vregs
        # xw[t] is a contiguous (B, H) tile in the T-major layout (zero-cost slice).
        h1 = jnp.tanh(xw[t] +
                      jnp.dot(h1, w_hh1, preferred_element_type=jnp.float32))
        # Two dots summed (no lane-axis concat on the serial dependency chain).
        h2 = jnp.tanh(jnp.dot(h1, w_ih2, preferred_element_type=jnp.float32) +
                      jnp.dot(h2, w_hh2, preferred_element_type=jnp.float32) + b2)
        h2_steps.append(h2)

    # Batched output projection + single contiguous writeback of the (T, B, D) slab.
    h2_all = jnp.stack(h2_steps, axis=0)            # (T, B, H) -- trivial axis-0 lay-down
    y = jnp.dot(h2_all.reshape(T * B, H), w_fc,
                preferred_element_type=jnp.float32)
    y = y + b_fc_ref[...]                           # (T*B, D)

    out_ref[...] = y.reshape(T, B, D).astype(out_ref.dtype)
    h1_out_ref[...] = h1.astype(h1_out_ref.dtype)
    h2_out_ref[...] = h2.astype(h2_out_ref.dtype)


def multi_regression_rnn(x_btd, h_1, h_2, params):
    """x_btd: (B, T, D_in) like PyTorch; returns (out_seq (B, T, D_in), h_1, h_2)."""
    B, T, D = x_btd.shape
    H = h_1.shape[1]

    # T-major input for the kernel (per-step slices become whole contiguous tiles).
    x_tbd = jnp.transpose(x_btd, (1, 0, 2))         # (T, B, D)

    vmem = lambda: pl.BlockSpec(memory_space=pltpu.MemorySpace.VMEM)

    out_tbd, h1_out, h2_out = pl.pallas_call(
        _rnn_kernel,
        out_shape=(
            jax.ShapeDtypeStruct((T, B, D), x_btd.dtype),
            jax.ShapeDtypeStruct((B, H), h_1.dtype),
            jax.ShapeDtypeStruct((B, H), h_2.dtype),
        ),
        in_specs=[vmem() for _ in range(11)],
        out_specs=(vmem(), vmem(), vmem()),
    )(x_tbd, h_1, h_2,
      params["w_ih1"], params["w_hh1"], params["b1"],
      params["w_ih2"], params["w_hh2"], params["b2"],
      params["w_fc"], params["b_fc"])

    # Layout plumbing back to the PyTorch (B, T, D) convention, done by XLA for free.
    out_seq = jnp.transpose(out_tbd, (1, 0, 2))
    return out_seq, h1_out, h2_out


def init_params(key, input_dim, hidden_dim):
    """Deterministic synthetic init (uniform(-1/sqrt(H), 1/sqrt(H)) like PyTorch)."""
    ks = jax.random.split(key, 9)
    s = 1.0 / jnp.sqrt(hidden_dim)
    u = lambda k, shape: jax.random.uniform(k, shape, jnp.float32, -s, s)
    return {
        # stored as (in, out); PyTorch stores (out, in) and computes x @ W^T
        "w_ih1": u(ks[0], (input_dim, hidden_dim)),
        "w_hh1": u(ks[1], (hidden_dim, hidden_dim)),
        "b1":    u(ks[2], (1, hidden_dim)) + u(ks[3], (1, hidden_dim)),  # b_ih + b_hh
        "w_ih2": u(ks[4], (hidden_dim, hidden_dim)),
        "w_hh2": u(ks[5], (hidden_dim, hidden_dim)),
        "b2":    u(ks[6], (1, hidden_dim)) + u(ks[7], (1, hidden_dim)),
        "w_fc":  u(ks[8], (hidden_dim, input_dim)),
        "b_fc":  jnp.zeros((1, input_dim), jnp.float32),
    }


def reference_forward(x, h_1, h_2, p):
    """Pure-JAX reference of the PyTorch forward loop, for validation."""
    outs = []
    T = x.shape[1]
    for t in range(T):
        h_1 = jnp.tanh(x[:, t, :] @ p["w_ih1"] + h_1 @ p["w_hh1"] + p["b1"])
        h_2 = jnp.tanh(h_1 @ p["w_ih2"] + h_2 @ p["w_hh2"] + p["b2"])
        outs.append(h_2 @ p["w_fc"] + p["b_fc"])
    return jnp.stack(outs, axis=1), h_1, h_2


if __name__ == "__main__":
    # Small shapes consistent with the module's forward (input_dim=6, hidden_dim=16).
    batch_size, time_steps, input_dim, hidden_dim = 8, 8, 6, 16

    key = jax.random.PRNGKey(0)
    k_x, k_p = jax.random.split(key)
    x = jax.random.normal(k_x, (batch_size, time_steps, input_dim), jnp.float32)
    h_1 = jnp.zeros((batch_size, hidden_dim), jnp.float32)  # init_hidden()
    h_2 = jnp.zeros((batch_size, hidden_dim), jnp.float32)
    params = init_params(k_p, input_dim, hidden_dim)

    out_seq, h1_f, h2_f = multi_regression_rnn(x, h_1, h_2, params)
    jax.block_until_ready((out_seq, h1_f, h2_f))

    ref_out, ref_h1, ref_h2 = reference_forward(x, h_1, h_2, params)
    assert out_seq.shape == (batch_size, time_steps, input_dim)
    assert jnp.allclose(out_seq, ref_out, atol=1e-5, rtol=1e-5)
    assert jnp.allclose(h1_f, ref_h1, atol=1e-5, rtol=1e-5)
    assert jnp.allclose(h2_f, ref_h2, atol=1e-5, rtol=1e-5)

    print("KERNEL_OK")
</pallas_src>

<mosaic_0001>
module attributes {stable_mosaic.version = 11 : i64} {
  func.func @_rnn_kernel(%arg0: memref<8x8x6xf32, #tpu.memory_space<vmem>>, %arg1: memref<8x16xf32, #tpu.memory_space<vmem>>, %arg2: memref<8x16xf32, #tpu.memory_space<vmem>>, %arg3: memref<6x16xf32, #tpu.memory_space<vmem>>, %arg4: memref<16x16xf32, #tpu.memory_space<vmem>>, %arg5: memref<1x16xf32, #tpu.memory_space<vmem>>, %arg6: memref<16x16xf32, #tpu.memory_space<vmem>>, %arg7: memref<16x16xf32, #tpu.memory_space<vmem>>, %arg8: memref<1x16xf32, #tpu.memory_space<vmem>>, %arg9: memref<16x6xf32, #tpu.memory_space<vmem>>, %arg10: memref<1x6xf32, #tpu.memory_space<vmem>>, %arg11: memref<8x8x6xf32, #tpu.memory_space<vmem>>, %arg12: memref<8x16xf32, #tpu.memory_space<vmem>>, %arg13: memref<8x16xf32, #tpu.memory_space<vmem>>) attributes {dimension_semantics = [], scalar_prefetch = 0 : i64, scratch_operands = 0 : i64, tpu.core_type = #tpu.core_type<tc>} {
    %c0 = arith.constant 0 : index
    %c0_0 = arith.constant 0 : index
    %c0_1 = arith.constant 0 : index
    %0 = vector.load %arg0[%c0, %c0_0, %c0_1] : memref<8x8x6xf32, #tpu.memory_space<vmem>>, vector<8x8x6xf32>
    %c0_2 = arith.constant 0 : index
    %c0_3 = arith.constant 0 : index
    %1 = vector.load %arg3[%c0_2, %c0_3] : memref<6x16xf32, #tpu.memory_space<vmem>>, vector<6x16xf32>
    %c0_4 = arith.constant 0 : index
    %c0_5 = arith.constant 0 : index
    %2 = vector.load %arg4[%c0_4, %c0_5] : memref<16x16xf32, #tpu.memory_space<vmem>>, vector<16x16xf32>
    %c0_6 = arith.constant 0 : index
    %c0_7 = arith.constant 0 : index
    %3 = vector.load %arg6[%c0_6, %c0_7] : memref<16x16xf32, #tpu.memory_space<vmem>>, vector<16x16xf32>
    %c0_8 = arith.constant 0 : index
    %c0_9 = arith.constant 0 : index
    %4 = vector.load %arg7[%c0_8, %c0_9] : memref<16x16xf32, #tpu.memory_space<vmem>>, vector<16x16xf32>
    %c0_10 = arith.constant 0 : index
    %c0_11 = arith.constant 0 : index
    %5 = vector.load %arg9[%c0_10, %c0_11] : memref<16x6xf32, #tpu.memory_space<vmem>>, vector<16x6xf32>
    %6 = vector.shape_cast %0 : vector<8x8x6xf32> to vector<64x6xf32>
    %cst = arith.constant dense<0.000000e+00> : vector<64x16xf32>
    %7 = tpu.matmul %6, %1, %cst {dimension_numbers = #tpu.dot_dimension_numbers<[1], [0], [0], [1], [0, 0, 1, 1], [], []>} : vector<64x6xf32>, vector<6x16xf32>, vector<64x16xf32> -> vector<64x16xf32>
    %8 = vector.shape_cast %7 : vector<64x16xf32> to vector<8x8x16xf32>
    %c0_12 = arith.constant 0 : index
    %c0_13 = arith.constant 0 : index
    %9 = vector.load %arg5[%c0_12, %c0_13] : memref<1x16xf32, #tpu.memory_space<vmem>>, vector<1x16xf32>
    %10 = vector.shape_cast %9 : vector<1x16xf32> to vector<1x1x16xf32>
    %11 = vector.broadcast %10 : vector<1x1x16xf32> to vector<8x8x16xf32>
    %12 = arith.addf %8, %11 : vector<8x8x16xf32>
    %c0_14 = arith.constant 0 : index
    %c0_15 = arith.constant 0 : index
    %13 = vector.load %arg8[%c0_14, %c0_15] : memref<1x16xf32, #tpu.memory_space<vmem>>, vector<1x16xf32>
    %14 = vector.shape_cast %13 : vector<1x16xf32> to vector<1x16xf32>
    %15 = vector.broadcast %14 : vector<1x16xf32> to vector<8x16xf32>
    %c0_16 = arith.constant 0 : index
    %c0_17 = arith.constant 0 : index
    %16 = vector.load %arg1[%c0_16, %c0_17] : memref<8x16xf32, #tpu.memory_space<vmem>>, vector<8x16xf32>
    %c0_18 = arith.constant 0 : index
    %c0_19 = arith.constant 0 : index
    %17 = vector.load %arg2[%c0_18, %c0_19] : memref<8x16xf32, #tpu.memory_space<vmem>>, vector<8x16xf32>
    %18 = vector.extract_strided_slice %12 {offsets = [0, 0, 0], sizes = [1, 8, 16], strides = [1, 1, 1]} : vector<8x8x16xf32> to vector<1x8x16xf32>
    %19 = vector.shape_cast %18 : vector<1x8x16xf32> to vector<8x16xf32>
    %cst_20 = arith.constant dense<0.000000e+00> : vector<8x16xf32>
    %20 = tpu.matmul %16, %2, %cst_20 {dimension_numbers = #tpu.dot_dimension_numbers<[1], [0], [0], [1], [0, 0, 1, 1], [], []>} : vector<8x16xf32>, vector<16x16xf32>, vector<8x16xf32> -> vector<8x16xf32>
    %21 = arith.addf %19, %20 : vector<8x16xf32>
    %22 = math.tanh %21 : vector<8x16xf32>
    %cst_21 = arith.constant dense<0.000000e+00> : vector<8x16xf32>
    %23 = tpu.matmul %22, %3, %cst_21 {dimension_numbers = #tpu.dot_dimension_numbers<[1], [0], [0], [1], [0, 0, 1, 1], [], []>} : vector<8x16xf32>, vector<16x16xf32>, vector<8x16xf32> -> vector<8x16xf32>
    %cst_22 = arith.constant dense<0.000000e+00> : vector<8x16xf32>
    %24 = tpu.matmul %17, %4, %cst_22 {dimension_numbers = #tpu.dot_dimension_numbers<[1], [0], [0], [1], [0, 0, 1, 1], [], []>} : vector<8x16xf32>, vector<16x16xf32>, vector<8x16xf32> -> vector<8x16xf32>
    %25 = arith.addf %23, %24 : vector<8x16xf32>
    %26 = arith.addf %25, %15 : vector<8x16xf32>
    %27 = math.tanh %26 : vector<8x16xf32>
    %28 = vector.extract_strided_slice %12 {offsets = [1, 0, 0], sizes = [1, 8, 16], strides = [1, 1, 1]} : vector<8x8x16xf32> to vector<1x8x16xf32>
    %29 = vector.shape_cast %28 : vector<1x8x16xf32> to vector<8x16xf32>
    %cst_23 = arith.constant dense<0.000000e+00> : vector<8x16xf32>
    %30 = tpu.matmul %22, %2, %cst_23 {dimension_numbers = #tpu.dot_dimension_numbers<[1], [0], [0], [1], [0, 0, 1, 1], [], []>} : vector<8x16xf32>, vector<16x16xf32>, vector<8x16xf32> -> vector<8x16xf32>
    %31 = arith.addf %29, %30 : vector<8x16xf32>
    %32 = math.tanh %31 : vector<8x16xf32>
    %cst_24 = arith.constant dense<0.000000e+00> : vector<8x16xf32>
    %33 = tpu.matmul %32, %3, %cst_24 {dimension_numbers = #tpu.dot_dimension_numbers<[1], [0], [0], [1], [0, 0, 1, 1], [], []>} : vector<8x16xf32>, vector<16x16xf32>, vector<8x16xf32> -> vector<8x16xf32>
    %cst_25 = arith.constant dense<0.000000e+00> : vector<8x16xf32>
    %34 = tpu.matmul %27, %4, %cst_25 {dimension_numbers = #tpu.dot_dimension_numbers<[1], [0], [0], [1], [0, 0, 1, 1], [], []>} : vector<8x16xf32>, vector<16x16xf32>, vector<8x16xf32> -> vector<8x16xf32>
    %35 = arith.addf %33, %34 : vector<8x16xf32>
    %36 = arith.addf %35, %15 : vector<8x16xf32>
    %37 = math.tanh %36 : vector<8x16xf32>
    %38 = vector.extract_strided_slice %12 {offsets = [2, 0, 0], sizes = [1, 8, 16], strides = [1, 1, 1]} : vector<8x8x16xf32> to vector<1x8x16xf32>
    %39 = vector.shape_cast %38 : vector<1x8x16xf32> to vector<8x16xf32>
    %cst_26 = arith.constant dense<0.000000e+00> : vector<8x16xf32>
    %40 = tpu.matmul %32, %2, %cst_26 {dimension_numbers = #tpu.dot_dimension_numbers<[1], [0], [0], [1], [0, 0, 1, 1], [], []>} : vector<8x16xf32>, vector<16x16xf32>, vector<8x16xf32> -> vector<8x16xf32>
    %41 = arith.addf %39, %40 : vector<8x16xf32>
    %42 = math.tanh %41 : vector<8x16xf32>
    %cst_27 = arith.constant dense<0.000000e+00> : vector<8x16xf32>
    %43 = tpu.matmul %42, %3, %cst_27 {dimension_numbers = #tpu.dot_dimension_numbers<[1], [0], [0], [1], [0, 0, 1, 1], [], []>} : vector<8x16xf32>, vector<16x16xf32>, vector<8x16xf32> -> vector<8x16xf32>
    %cst_28 = arith.constant dense<0.000000e+00> : vector<8x16xf32>
    %44 = tpu.matmul %37, %4, %cst_28 {dimension_numbers = #tpu.dot_dimension_numbers<[1], [0], [0], [1], [0, 0, 1, 1], [], []>} : vector<8x16xf32>, vector<16x16xf32>, vector<8x16xf32> -> vector<8x16xf32>
    %45 = arith.addf %43, %44 : vector<8x16xf32>
    %46 = arith.addf %45, %15 : vector<8x16xf32>
    %47 = math.tanh %46 : vector<8x16xf32>
    %48 = vector.extract_strided_slice %12 {offsets = [3, 0, 0], sizes = [1, 8, 16], strides = [1, 1, 1]} : vector<8x8x16xf32> to vector<1x8x16xf32>
    %49 = vector.shape_cast %48 : vector<1x8x16xf32> to vector<8x16xf32>
    %cst_29 = arith.constant dense<0.000000e+00> : vector<8x16xf32>
    %50 = tpu.matmul %42, %2, %cst_29 {dimension_numbers = #tpu.dot_dimension_numbers<[1], [0], [0], [1], [0, 0, 1, 1], [], []>} : vector<8x16xf32>, vector<16x16xf32>, vector<8x16xf32> -> vector<8x16xf32>
    %51 = arith.addf %49, %50 : vector<8x16xf32>
    %52 = math.tanh %51 : vector<8x16xf32>
    %cst_30 = arith.constant dense<0.000000e+00> : vector<8x16xf32>
    %53 = tpu.matmul %52, %3, %cst_30 {dimension_numbers = #tpu.dot_dimension_numbers<[1], [0], [0], [1], [0, 0, 1, 1], [], []>} : vector<8x16xf32>, vector<16x16xf32>, vector<8x16xf32> -> vector<8x16xf32>
    %cst_31 = arith.constant dense<0.000000e+00> : vector<8x16xf32>
    %54 = tpu.matmul %47, %4, %cst_31 {dimension_numbers = #tpu.dot_dimension_numbers<[1], [0], [0], [1], [0, 0, 1, 1], [], []>} : vector<8x16xf32>, vector<16x16xf32>, vector<8x16xf32> -> vector<8x16xf32>
    %55 = arith.addf %53, %54 : vector<8x16xf32>
    %56 = arith.addf %55, %15 : vector<8x16xf32>
    %57 = math.tanh %56 : vector<8x16xf32>
    %58 = vector.extract_strided_slice %12 {offsets = [4, 0, 0], sizes = [1, 8, 16], strides = [1, 1, 1]} : vector<8x8x16xf32> to vector<1x8x16xf32>
    %59 = vector.shape_cast %58 : vector<1x8x16xf32> to vector<8x16xf32>
    %cst_32 = arith.constant dense<0.000000e+00> : vector<8x16xf32>
    %60 = tpu.matmul %52, %2, %cst_32 {dimension_numbers = #tpu.dot_dimension_numbers<[1], [0], [0], [1], [0, 0, 1, 1], [], []>} : vector<8x16xf32>, vector<16x16xf32>, vector<8x16xf32> -> vector<8x16xf32>
    %61 = arith.addf %59, %60 : vector<8x16xf32>
    %62 = math.tanh %61 : vector<8x16xf32>
    %cst_33 = arith.constant dense<0.000000e+00> : vector<8x16xf32>
    %63 = tpu.matmul %62, %3, %cst_33 {dimension_numbers = #tpu.dot_dimension_numbers<[1], [0], [0], [1], [0, 0, 1, 1], [], []>} : vector<8x16xf32>, vector<16x16xf32>, vector<8x16xf32> -> vector<8x16xf32>
    %cst_34 = arith.constant dense<0.000000e+00> : vector<8x16xf32>
    %64 = tpu.matmul %57, %4, %cst_34 {dimension_numbers = #tpu.dot_dimension_numbers<[1], [0], [0], [1], [0, 0, 1, 1], [], []>} : vector<8x16xf32>, vector<16x16xf32>, vector<8x16xf32> -> vector<8x16xf32>
    %65 = arith.addf %63, %64 : vector<8x16xf32>
    %66 = arith.addf %65, %15 : vector<8x16xf32>
    %67 = math.tanh %66 : vector<8x16xf32>
    %68 = vector.extract_strided_slice %12 {offsets = [5, 0, 0], sizes = [1, 8, 16], strides = [1, 1, 1]} : vector<8x8x16xf32> to vector<1x8x16xf32>
    %69 = vector.shape_cast %68 : vector<1x8x16xf32> to vector<8x16xf32>
    %cst_35 = arith.constant dense<0.000000e+00> : vector<8x16xf32>
    %70 = tpu.matmul %62, %2, %cst_35 {dimension_numbers = #tpu.dot_dimension_numbers<[1], [0], [0], [1], [0, 0, 1, 1], [], []>} : vector<8x16xf32>, vector<16x16xf32>, vector<8x16xf32> -> vector<8x16xf32>
    %71 = arith.addf %69, %70 : vector<8x16xf32>
    %72 = math.tanh %71 : vector<8x16xf32>
    %cst_36 = arith.constant dense<0.000000e+00> : vector<8x16xf32>
    %73 = tpu.matmul %72, %3, %cst_36 {dimension_numbers = #tpu.dot_dimension_numbers<[1], [0], [0], [1], [0, 0, 1, 1], [], []>} : vector<8x16xf32>, vector<16x16xf32>, vector<8x16xf32> -> vector<8x16xf32>
    %cst_37 = arith.constant dense<0.000000e+00> : vector<8x16xf32>
    %74 = tpu.matmul %67, %4, %cst_37 {dimension_numbers = #tpu.dot_dimension_numbers<[1], [0], [0], [1], [0, 0, 1, 1], [], []>} : vector<8x16xf32>, vector<16x16xf32>, vector<8x16xf32> -> vector<8x16xf32>
    %75 = arith.addf %73, %74 : vector<8x16xf32>
    %76 = arith.addf %75, %15 : vector<8x16xf32>
    %77 = math.tanh %76 : vector<8x16xf32>
    %78 = vector.extract_strided_slice %12 {offsets = [6, 0, 0], sizes = [1, 8, 16], strides = [1, 1, 1]} : vector<8x8x16xf32> to vector<1x8x16xf32>
    %79 = vector.shape_cast %78 : vector<1x8x16xf32> to vector<8x16xf32>
    %cst_38 = arith.constant dense<0.000000e+00> : vector<8x16xf32>
    %80 = tpu.matmul %72, %2, %cst_38 {dimension_numbers = #tpu.dot_dimension_numbers<[1], [0], [0], [1], [0, 0, 1, 1], [], []>} : vector<8x16xf32>, vector<16x16xf32>, vector<8x16xf32> -> vector<8x16xf32>
    %81 = arith.addf %79, %80 : vector<8x16xf32>
    %82 = math.tanh %81 : vector<8x16xf32>
    %cst_39 = arith.constant dense<0.000000e+00> : vector<8x16xf32>
    %83 = tpu.matmul %82, %3, %cst_39 {dimension_numbers = #tpu.dot_dimension_numbers<[1], [0], [0], [1], [0, 0, 1, 1], [], []>} : vector<8x16xf32>, vector<16x16xf32>, vector<8x16xf32> -> vector<8x16xf32>
    %cst_40 = arith.constant dense<0.000000e+00> : vector<8x16xf32>
    %84 = tpu.matmul %77, %4, %cst_40 {dimension_numbers = #tpu.dot_dimension_numbers<[1], [0], [0], [1], [0, 0, 1, 1], [], []>} : vector<8x16xf32>, vector<16x16xf32>, vector<8x16xf32> -> vector<8x16xf32>
    %85 = arith.addf %83, %84 : vector<8x16xf32>
    %86 = arith.addf %85, %15 : vector<8x16xf32>
    %87 = math.tanh %86 : vector<8x16xf32>
    %88 = vector.extract_strided_slice %12 {offsets = [7, 0, 0], sizes = [1, 8, 16], strides = [1, 1, 1]} : vector<8x8x16xf32> to vector<1x8x16xf32>
    %89 = vector.shape_cast %88 : vector<1x8x16xf32> to vector<8x16xf32>
    %cst_41 = arith.constant dense<0.000000e+00> : vector<8x16xf32>
    %90 = tpu.matmul %82, %2, %cst_41 {dimension_numbers = #tpu.dot_dimension_numbers<[1], [0], [0], [1], [0, 0, 1, 1], [], []>} : vector<8x16xf32>, vector<16x16xf32>, vector<8x16xf32> -> vector<8x16xf32>
    %91 = arith.addf %89, %90 : vector<8x16xf32>
    %92 = math.tanh %91 : vector<8x16xf32>
    %cst_42 = arith.constant dense<0.000000e+00> : vector<8x16xf32>
    %93 = tpu.matmul %92, %3, %cst_42 {dimension_numbers = #tpu.dot_dimension_numbers<[1], [0], [0], [1], [0, 0, 1, 1], [], []>} : vector<8x16xf32>, vector<16x16xf32>, vector<8x16xf32> -> vector<8x16xf32>
    %cst_43 = arith.constant dense<0.000000e+00> : vector<8x16xf32>
    %94 = tpu.matmul %87, %4, %cst_43 {dimension_numbers = #tpu.dot_dimension_numbers<[1], [0], [0], [1], [0, 0, 1, 1], [], []>} : vector<8x16xf32>, vector<16x16xf32>, vector<8x16xf32> -> vector<8x16xf32>
    %95 = arith.addf %93, %94 : vector<8x16xf32>
    %96 = arith.addf %95, %15 : vector<8x16xf32>
    %97 = math.tanh %96 : vector<8x16xf32>
    %98 = vector.shape_cast %27 : vector<8x16xf32> to vector<1x8x16xf32>
    %99 = vector.shape_cast %37 : vector<8x16xf32> to vector<1x8x16xf32>
    %100 = vector.shape_cast %47 : vector<8x16xf32> to vector<1x8x16xf32>
    %101 = vector.shape_cast %57 : vector<8x16xf32> to vector<1x8x16xf32>
    %102 = vector.shape_cast %67 : vector<8x16xf32> to vector<1x8x16xf32>
    %103 = vector.shape_cast %77 : vector<8x16xf32> to vector<1x8x16xf32>
    %104 = vector.shape_cast %87 : vector<8x16xf32> to vector<1x8x16xf32>
    %105 = vector.shape_cast %97 : vector<8x16xf32> to vector<1x8x16xf32>
    %106 = tpu.concatenate %98, %99, %100, %101, %102, %103, %104, %105 in 0 : vector<1x8x16xf32>, vector<1x8x16xf32>, vector<1x8x16xf32>, vector<1x8x16xf32>, vector<1x8x16xf32>, vector<1x8x16xf32>, vector<1x8x16xf32>, vector<1x8x16xf32> -> vector<8x8x16xf32>
    %107 = vector.shape_cast %106 : vector<8x8x16xf32> to vector<64x16xf32>
    %cst_44 = arith.constant dense<0.000000e+00> : vector<64x6xf32>
    %108 = tpu.matmul %107, %5, %cst_44 {dimension_numbers = #tpu.dot_dimension_numbers<[1], [0], [0], [1], [0, 0, 1, 1], [], []>} : vector<64x16xf32>, vector<16x6xf32>, vector<64x6xf32> -> vector<64x6xf32>
    %c0_45 = arith.constant 0 : index
    %c0_46 = arith.constant 0 : index
    %109 = vector.load %arg10[%c0_45, %c0_46] : memref<1x6xf32, #tpu.memory_space<vmem>>, vector<1x6xf32>
    %110 = vector.broadcast %109 : vector<1x6xf32> to vector<64x6xf32>
    %111 = arith.addf %108, %110 : vector<64x6xf32>
    %112 = vector.shape_cast %111 : vector<64x6xf32> to vector<8x8x6xf32>
    %c0_47 = arith.constant 0 : index
    %c0_48 = arith.constant 0 : index
    %c0_49 = arith.constant 0 : index
    %113 = vector.load %arg11[%c0_47, %c0_48, %c0_49] : memref<8x8x6xf32, #tpu.memory_space<vmem>>, vector<8x8x6xf32>
    tpu.vector_store %arg11[%c0_47, %c0_48, %c0_49], %112 {strides = array<i32>} : memref<8x8x6xf32, #tpu.memory_space<vmem>>, vector<8x8x6xf32>,
    %c0_50 = arith.constant 0 : index
    %c0_51 = arith.constant 0 : index
    %114 = vector.load %arg12[%c0_50, %c0_51] : memref<8x16xf32, #tpu.memory_space<vmem>>, vector<8x16xf32>
    tpu.vector_store %arg12[%c0_50, %c0_51], %92 {strides = array<i32>} : memref<8x16xf32, #tpu.memory_space<vmem>>, vector<8x16xf32>,
    %c0_52 = arith.constant 0 : index
    %c0_53 = arith.constant 0 : index
    %115 = vector.load %arg13[%c0_52, %c0_53] : memref<8x16xf32, #tpu.memory_space<vmem>>, vector<8x16xf32>
    tpu.vector_store %arg13[%c0_52, %c0_53], %97 {strides = array<i32>} : memref<8x16xf32, #tpu.memory_space<vmem>>, vector<8x16xf32>,
    return
  }
}

</mosaic_0001>

<bundles_post_ra>
// kernel: tpu_custom_call.1
= control target key start
LH: loop header
LB: loop body
LE: loop exit
PB: predicated region body
PF: predicated region fallthrough
CT: control target
= control target key end

     0   :  { %19 = vsyncpa [#allocation3], 0  ;;  %vm85_vm0 = vcmask 1045504   ;;  %vm60_vm1 = vcmask 48128   ;;  %v2635_v8 = vmov 0.0|0.0   ;;  %s3032_s0 = inlined_call_operand.vmem [shape: f32[8,8,6], index: 0, kind: input, shape index: {}]   ;;  %s3033_s1 = inlined_call_operand.vmem [shape: f32[8,16], index: 1, kind: input, shape index: {}]   ;;  %s3034_s2 = inlined_call_operand.vmem [shape: f32[8,16], index: 2, kind: input, shape index: {}]   ;;  %s3035_s3 = inlined_call_operand.vmem [shape: f32[6,16], index: 3, kind: input, shape index: {}]   ;;  %s3036_s4 = inlined_call_operand.vmem [shape: f32[16,16], index: 4, kind: input, shape index: {}]   ;;  %s3037_s5 = inlined_call_operand.vmem [shape: f32[1,16], index: 5, kind: input, shape index: {}]   ;;  %s3038_s6 = inlined_call_operand.vmem [shape: f32[16,16], index: 6, kind: input, shape index: {}]   ;;  %s3039_s7 = inlined_call_operand.vmem [shape: f32[16,16], index: 7, kind: input, shape index: {}]   ;;  %s3040_s8 = inlined_call_operand.vmem [shape: f32[1,16], index: 8, kind: input, shape index: {}]   ;;  %s3041_s9 = inlined_call_operand.vmem [shape: f32[16,6], index: 9, kind: input, shape index: {}]   ;;  %s3042_s10 = inlined_call_operand.vmem [shape: f32[1,6], index: 10, kind: input, shape index: {}]   ;;  %s3043_s11 = inlined_call_operand.vmem [shape: f32[8,8,6], index: 11, kind: output, shape index: {0}]   ;;  %s3044_s12 = inlined_call_operand.hbm [shape: f32[8,16], index: 12, kind: output, shape index: {1}]   ;;  %s3045_s13 = inlined_call_operand.hbm [shape: f32[8,16], index: 13, kind: output, shape index: {2}]  }
   0x1   :  { %v51_v0 = vld [vmem:[%s3035_s3] sm:$0x3f]  ;;  %v48_v2 = vld [vmem:[%s3032_s0 + $0x28] sm:$0xff]  ;;  %v49_v5 = vld [vmem:[%s3032_s0 + $0x30] sm:$0xff] }
   0x2   :  { %v47_v1 = vld [vmem:[%s3032_s0 + $0x20] sm:$0xff]  ;;  %2548 = vmatprep.subr.msk.mxu1 %vm85_vm0, %v51_v0  ;;  %v53_v4 = vld [vmem:[%s3036_s4 + $0x8] sm:$0xff]  ;;  %2274 = vmatprep.subr.msk.mxu0 %vm85_vm0, %v51_v0 }
   0x3   :  { %2282 = vmatprep.mubr.msk.f32.mxu1 %vm60_vm1, %v47_v1  ;;  %v52_v3 = vld [vmem:[%s3036_s4] sm:$0xff]  ;;  %2549 = vmatpush3.msk.msra.mxu1 %vm85_vm0, %v51_v0  ;;  %v44_v9 = vld [vmem:[%s3032_s0 + $0x8] sm:$0xff] }
   0x4   :  { %v2731_v6 = vpack.c.bf16 %v53_v4, %v52_v3  ;;  %v43_v7 = vld [vmem:[%s3032_s0] sm:$0xff]  ;;  %2283 = vmatmul.mubr.msk.f32.vlgmr.msra.gmra.mrb[0].mxu1 %vm60_vm1, %v48_v2  ;;  %2472 = vmatprep.subr.bf16.mxu1 %v2635_v8 }
   0x5   :  { %20 = vsyncpa [#allocation5], 0  ;;  %2285 = vmatprep.mubr.msk.f32.mxu1 %vm60_vm1, %v49_v5  ;;  %v50_v10 = vld [vmem:[%s3032_s0 + $0x38] sm:$0xff]  ;;  %2275 = vmatpush3.msk.msra.mxu0 %vm85_vm0, %v51_v0  ;;  %vm2636_vm2 = vmmov 0   ;;  %v2637_v11 = vmov 0.0   ;;  %v216_v12 = vld [vmem:[%s3033_s1] sm:$0xff] }
   0x6   :  { %2474 = vmatpush3.bf16.msra.mxu1 %v2731_v6  ;;  %2276 = vmatprep.mubr.msk.f32.mxu0 %vm60_vm1, %v43_v7  ;;  %vm218_vm3 = vcmask 130048   ;;  %v56_v13 = vld [vmem:[%s3039_s7] sm:$0xff]  ;;  %v57_v14 = vld [vmem:[%s3039_s7 + $0x8] sm:$0xff]  ;;  %v45_v34 = vld [vmem:[%s3032_s0 + $0x10] sm:$0xff]  ;;  %s2638_s16 = smov [#allocation2]  }
   0x7   :  { %2277 = vmatmul.mubr.msk.f32.vlgmr.msra.gmra.mrb[0].mxu0 %vm60_vm1, %v44_v9  ;;  %2475 = vmatprep.subr.bf16.mxu1 %v2635_v8  ;;  %v2767_v15 = vpack.c.bf16 %v57_v14, %v56_v13  ;;  %v54_v16 = vld [vmem:[%s3038_s6] sm:$0xff]  ;;  %v55_v17 = vld [vmem:[%s3038_s6 + $0x8] sm:$0xff]  ;;  %v46_v35 = vld [vmem:[%s3032_s0 + $0x18] sm:$0xff]  ;;  %s2115_s3 = sshll.u32 %s2638_s16, 4  ;;  %s2116_s3 = int_to_ptr.vmem [resolvable:$true] %s2115_s3 }
   0x8   :  { %2286 = vmatmul.mubr.msk.f32.gmra.mrb[2].mxu1 %vm60_vm1, %v50_v10  ;;  %2484 = vmatprep.subr.bf16.mxu0 %v2635_v8  ;;  %v217_v18 = vld [vmem:[%s3034_s2] sm:$0xff]  ;;  %v2779_v19 = vpack.c.bf16 %v55_v17, %v54_v16  ;;  %s2639_s2 = smov [#allocation4]   ;;  %p2592_p1 = scmp.lt.s32.totalorder %s2116_s3, %s2116_s3 }
   0x9   :  { %2292 = vmatprep.mubr.msk.f32.mxu1 %vm2636_vm2, %v2637_v11  ;;  %2486 = vmatpush3.bf16.msra.mxu0 %v2767_v15  ;;  %v2796_v23 = vld [vmem:[%s3037_s5] ss:$0 sm:$0xff]  ;;  %s2125_s6 = sshll.u32 %s2639_s2, 4  ;;  %s2587_s5 = scalar_lea.vmem %s2116_s3, 128  ;;  %s2126_s6 = int_to_ptr.vmem [resolvable:$true] %s2125_s6 }
   0xa   :  { %2490 = vmatprep.subr.bf16.mxu0 %v2635_v8  ;;  %2279 = vmatprep.mubr.msk.f32.mxu0 %vm60_vm1, %v45_v34  ;;  %v2826_v36 = vld [vmem:[%s3040_s8] ss:$0 sm:$0xff]  ;;  %p2588_p0 = scmp.ne.s32.totalorder %s2116_s3, %s2587_s5  ;;  %p2593_p2 = scmp.lt.s32.totalorder %s2587_s5, %s2587_s5 }
   0xb   :  { %2280 = vmatmul.mubr.msk.f32.gmra.mrb[2].mxu0 %vm60_vm1, %v46_v35 }
   0xc   :  { %2293 = vmatmul.mubr.msk.f32.vlgmr.msra.gmra.mrb[4].mxu1 %vm218_vm3, %v216_v12  ;;  %2320 = vmatprep.mubr.msk.f32.mxu0 %vm2636_vm2, %v2637_v11  ;;  %p2594_p3 = por %p2593_p2, %p2592_p1 }
   0xd   :  { %2299 = vmatprep.mubr.msk.f32.mxu1 %vm2636_vm2, %v2637_v11  ;;  %2477 = vmatpush3.bf16.msra.mxu1 %v2767_v15 }
   0xe   :  { %2478 = vmatprep.subr.bf16.mxu1 %v2635_v8  ;;  %p2595_p4 = pnand %p2594_p3, %p2588_p0 }
  0x10   :  { %2300 = vmatmul.mubr.msk.f32.vlgmr.msra.gmra.mrb[6].mxu1 %vm218_vm3, %v217_v18 }
  0x11   :  { %2480 = vmatpush3.bf16.msra.mxu1 %v2779_v19  ;;  %2306 = vmatprep.mubr.msk.f32.mxu1 %vm2636_vm2, %v2637_v11 }
  0x12   :  { %2481 = vmatprep.subr.bf16.mxu1 %v2635_v8 }
  0xd7   :  { %v2789_v20 = vpop.f32.mrb[0].mxu1 }
  0xd8   :  { %v2791_v21 = vpop.f32.mrb[1].mxu1  ;;  %v206_v35 = vadd.f32 %v2789_v20, %v2796_v23 }
  0xd9   :  { %v205_v18 = vadd.f32 %v2796_v23, %v2791_v21 }
  0xda   :  { %v2278_v22 = vpop.f32.mrb[0].mxu0 }
  0xdb   :  { %v2798_v24 = vpop.f32.mrb[2].mxu1  ;;  %v155_v25 = vpop.f32.mrb[1].mxu0  ;;  %v202_v40 = vadd.f32 %v2278_v22, %v2796_v23 }
  0xdc   :  { %v2800_v26 = vpop.f32.mrb[3].mxu1  ;;  %v201_v27 = vadd.f32 %v2796_v23, %v155_v25 }
  0xde   :  { %v2281_v47 = vpop.f32.mrb[2].mxu0 }
  0xdf   :  { %v288_v28 = vpop.f32.mrb[4].mxu1  ;;  %v165_v48 = vpop.f32.mrb[3].mxu0  ;;  %v204_v2 = vadd.f32 %v2281_v47, %v2796_v23 }
  0xe0   :  { %v292_v29 = vadd.f32 %v288_v28, %v201_v27  ;;  %v2294_v30 = vpop.f32.mrb[5].mxu1  ;;  %v203_v52 = vadd.f32 %v2796_v23, %v165_v48  ;;  %v207_v48 = vadd.f32 %v2796_v23, %v2800_v26 }
  0xe2   :  { %2555 = vtanh.f32 %v292_v29 }
  0xe3   :  { %v363_v32 = vpop.f32.mrb[6].mxu1 }
  0xe4   :  { %v2301_v33 = vpop.f32.mrb[7].mxu1 }
  0xec   :  { %v2556_v31 = vpop.eup %2555 }
  0xed   :  { %2307 = vmatmul.mubr.msk.f32.vlgmr.msra.gmra.mrb[8].mxu1 %vm218_vm3, %v2556_v31 }
  0xee   :  { %2483 = vmatpush3.bf16.msra.mxu1 %v2731_v6  ;;  %2313 = vmatprep.mubr.msk.f32.mxu1 %vm2636_vm2, %v2637_v11 }
  0xef   :  { %2487 = vmatprep.subr.bf16.mxu1 %v2635_v8 }
  0xf1   :  { %2314 = vmatmul.mubr.msk.f32.vlgmr.msra.gmra.mrb[10].mxu1 %vm218_vm3, %v2556_v31 }
  0xf2   :  { %2489 = vmatpush3.bf16.msra.mxu1 %v2779_v19  ;;  %2327 = vmatprep.mubr.msk.f32.mxu1 %vm2636_vm2, %v2637_v11 }
  0xf3   :  { %2493 = vmatprep.subr.bf16.mxu1 %v2635_v8 }
 0x1c0   :  { %v436_v37 = vpop.f32.mrb[8].mxu1 }
 0x1c1   :  { %v437_v38 = vadd.f32 %v436_v37, %v363_v32  ;;  %v2308_v39 = vpop.f32.mrb[9].mxu1 }
 0x1c3   :  { %v440_v41 = vadd.f32 %v2826_v36, %v437_v38 }
 0x1c4   :  { %v508_v42 = vpop.f32.mrb[10].mxu1 }
 0x1c5   :  { %2557 = vtanh.f32 %v440_v41  ;;  %v512_v43 = vadd.f32 %v508_v42, %v202_v40  ;;  %v2315_v44 = vpop.f32.mrb[11].mxu1 }
 0x1c7   :  { %2559 = vtanh.f32 %v512_v43 }
 0x1cf   :  { %v2830_v45 = vpop.eup %2557 }
 0x1d0   :  { %2321 = vmatmul.mubr.msk.f32.vlgmr.msra.gmra.mrb[4].mxu0 %vm218_vm3, %v2830_v45 }
 0x1d1   :  { %v2560_v46 = vpop.eup %2559  ;;  %2492 = vmatpush3.bf16.msra.mxu0 %v2731_v6  ;;  %2334 = vmatprep.mubr.msk.f32.mxu0 %vm2636_vm2, %v2637_v11 }
 0x1d2   :  { %2328 = vmatmul.mubr.msk.f32.vlgmr.msra.gmra.mrb[12].mxu1 %vm218_vm3, %v2560_v46  ;;  %2496 = vmatprep.subr.bf16.mxu0 %v2635_v8 }
 0x1d3   :  { %2495 = vmatpush3.bf16.msra.mxu1 %v2767_v15  ;;  %2341 = vmatprep.mubr.msk.f32.mxu1 %vm2636_vm2, %v2637_v11 }
 0x1d4   :  { %2335 = vmatmul.mubr.msk.f32.vlgmr.msra.gmra.mrb[6].mxu0 %vm218_vm3, %v2560_v46  ;;  %2499 = vmatprep.subr.bf16.mxu1 %v2635_v8 }
 0x1d5   :  { %2498 = vmatpush3.bf16.msra.mxu0 %v2779_v19  ;;  %2348 = vmatprep.mubr.msk.f32.mxu0 %vm2636_vm2, %v2637_v11 }
 0x1d6   :  { %2502 = vmatprep.subr.bf16.mxu0 %v2635_v8 }
 0x2a3   :  { %v583_v49 = vpop.f32.mrb[4].mxu0 }
 0x2a4   :  { %v2322_v50 = vpop.f32.mrb[5].mxu0 }
 0x2a5   :  { %v656_v51 = vpop.f32.mrb[12].mxu1 }
 0x2a6   :  { %v657_v53 = vadd.f32 %v656_v51, %v583_v49  ;;  %v2329_v54 = vpop.f32.mrb[13].mxu1 }
 0x2a7   :  { %v728_v55 = vpop.f32.mrb[6].mxu0 }
 0x2a8   :  { %v660_v56 = vadd.f32 %v2826_v36, %v657_v53  ;;  %v732_v57 = vadd.f32 %v728_v55, %v203_v52  ;;  %v2336_v58 = vpop.f32.mrb[7].mxu0 }
 0x2aa   :  { %2561 = vtanh.f32 %v660_v56 }
 0x2ab   :  { %2563 = vtanh.f32 %v732_v57 }
 0x2b4   :  { %v2850_v59 = vpop.eup %2561 }
 0x2b5   :  { %v2564_v60 = vpop.eup %2563  ;;  %2342 = vmatmul.mubr.msk.f32.vlgmr.msra.gmra.mrb[14].mxu1 %vm218_vm3, %v2850_v59 }
 0x2b6   :  { %2349 = vmatmul.mubr.msk.f32.vlgmr.msra.gmra.mrb[8].mxu0 %vm218_vm3, %v2564_v60  ;;  %2501 = vmatpush3.bf16.msra.mxu1 %v2731_v6 }
 0x2b7   :  { %2355 = vmatprep.mubr.msk.f32.mxu1 %vm2636_vm2, %v2637_v11  ;;  %2504 = vmatpush3.bf16.msra.mxu0 %v2767_v15 }
 0x2b8   :  { %2505 = vmatprep.subr.bf16.mxu1 %v2635_v8  ;;  %2362 = vmatprep.mubr.msk.f32.mxu0 %vm2636_vm2, %v2637_v11 }
 0x2b9   :  { %2356 = vmatmul.mubr.msk.f32.vlgmr.msra.gmra.mrb[16].mxu1 %vm218_vm3, %v2564_v60  ;;  %2508 = vmatprep.subr.bf16.mxu0 %v2635_v8 }
 0x2ba   :  { %2507 = vmatpush3.bf16.msra.mxu1 %v2779_v19  ;;  %2369 = vmatprep.mubr.msk.f32.mxu1 %vm2636_vm2, %v2637_v11 }
 0x2bb   :  { %2511 = vmatprep.subr.bf16.mxu1 %v2635_v8 }
 0x388   :  { %v803_v61 = vpop.f32.mrb[14].mxu1 }
 0x389   :  { %v876_v62 = vpop.f32.mrb[8].mxu0  ;;  %v2343_v63 = vpop.f32.mrb[15].mxu1 }
 0x38a   :  { %v877_v0 = vadd.f32 %v876_v62, %v803_v61  ;;  %v2350_v1 = vpop.f32.mrb[9].mxu0 }
 0x38c   :  { %v880_v3 = vadd.f32 %v2826_v36, %v877_v0  ;;  %v948_v4 = vpop.f32.mrb[16].mxu1 }
 0x38d   :  { %v952_v5 = vadd.f32 %v948_v4, %v204_v2  ;;  %v2357_v7 = vpop.f32.mrb[17].mxu1 }
 0x38e   :  { %2565 = vtanh.f32 %v880_v3 }
 0x38f   :  { %2567 = vtanh.f32 %v952_v5 }
 0x398   :  { %v2870_v9 = vpop.eup %2565 }
 0x399   :  { %v2568_v10 = vpop.eup %2567  ;;  %2363 = vmatmul.mubr.msk.f32.vlgmr.msra.gmra.mrb[10].mxu0 %vm218_vm3, %v2870_v9 }
 0x39a   :  { %2510 = vmatpush3.bf16.msra.mxu0 %v2731_v6  ;;  %2370 = vmatmul.mubr.msk.f32.vlgmr.msra.gmra.mrb[18].mxu1 %vm218_vm3, %v2568_v10 }
 0x39b   :  { %2376 = vmatprep.mubr.msk.f32.mxu0 %vm2636_vm2, %v2637_v11  ;;  %2514 = vmatprep.subr.bf16.mxu0 %v2635_v8 }
 0x39c   :  { %2513 = vmatpush3.bf16.msra.mxu1 %v2767_v15  ;;  %2383 = vmatprep.mubr.msk.f32.mxu1 %vm2636_vm2, %v2637_v11 }
 0x39d   :  { %2377 = vmatmul.mubr.msk.f32.vlgmr.msra.gmra.mrb[12].mxu0 %vm218_vm3, %v2568_v10  ;;  %2517 = vmatprep.subr.bf16.mxu1 %v2635_v8 }
 0x39e   :  { %2516 = vmatpush3.bf16.msra.mxu0 %v2779_v19  ;;  %2390 = vmatprep.mubr.msk.f32.mxu0 %vm2636_vm2, %v2637_v11 }
 0x39f   :  { %2520 = vmatprep.subr.bf16.mxu0 %v2635_v8 }
 0x46c   :  { %v1023_v12 = vpop.f32.mrb[10].mxu0 }
 0x46d   :  { %v2364_v13 = vpop.f32.mrb[11].mxu0  ;;  %v1096_v14 = vpop.f32.mrb[18].mxu1 }
 0x46e   :  { %v1097_v16 = vadd.f32 %v1096_v14, %v1023_v12  ;;  %v2371_v17 = vpop.f32.mrb[19].mxu1 }
 0x470   :  { %v1100_v22 = vadd.f32 %v2826_v36, %v1097_v16  ;;  %v1168_v25 = vpop.f32.mrb[12].mxu0 }
 0x471   :  { %v1172_v27 = vadd.f32 %v1168_v25, %v205_v18  ;;  %v2378_v28 = vpop.f32.mrb[13].mxu0 }
 0x472   :  { %2569 = vtanh.f32 %v1100_v22 }
 0x473   :  { %2571 = vtanh.f32 %v1172_v27 }
 0x47c   :  { %v2891_v29 = vpop.eup %2569 }
 0x47d   :  { %v2572_v30 = vpop.eup %2571  ;;  %2384 = vmatmul.mubr.msk.f32.vlgmr.msra.gmra.mrb[20].mxu1 %vm218_vm3, %v2891_v29 }
 0x47e   :  { %2391 = vmatmul.mubr.msk.f32.vlgmr.msra.gmra.mrb[14].mxu0 %vm218_vm3, %v2572_v30  ;;  %2519 = vmatpush3.bf16.msra.mxu1 %v2731_v6 }
 0x47f   :  { %2397 = vmatprep.mubr.msk.f32.mxu1 %vm2636_vm2, %v2637_v11  ;;  %2522 = vmatpush3.bf16.msra.mxu0 %v2767_v15 }
 0x480   :  { %2523 = vmatprep.subr.bf16.mxu1 %v2635_v8  ;;  %2404 = vmatprep.mubr.msk.f32.mxu0 %vm2636_vm2, %v2637_v11 }
 0x481   :  { %2398 = vmatmul.mubr.msk.f32.vlgmr.msra.gmra.mrb[22].mxu1 %vm218_vm3, %v2572_v30  ;;  %2526 = vmatprep.subr.bf16.mxu0 %v2635_v8 }
 0x482   :  { %2525 = vmatpush3.bf16.msra.mxu1 %v2779_v19  ;;  %2411 = vmatprep.mubr.msk.f32.mxu1 %vm2636_vm2, %v2637_v11 }
 0x483   :  { %2529 = vmatprep.subr.bf16.mxu1 %v2635_v8 }
 0x550   :  { %v1243_v21 = vpop.f32.mrb[20].mxu1 }
 0x551   :  { %v1316_v31 = vpop.f32.mrb[14].mxu0  ;;  %v2385_v32 = vpop.f32.mrb[21].mxu1 }
 0x552   :  { %v1317_v33 = vadd.f32 %v1316_v31, %v1243_v21  ;;  %v2392_v34 = vpop.f32.mrb[15].mxu0 }
 0x554   :  { %v1320_v37 = vadd.f32 %v2826_v36, %v1317_v33  ;;  %v1388_v38 = vpop.f32.mrb[22].mxu1 }
 0x555   :  { %v1392_v39 = vadd.f32 %v1388_v38, %v206_v35  ;;  %v2399_v40 = vpop.f32.mrb[23].mxu1 }
 0x556   :  { %2573 = vtanh.f32 %v1320_v37 }
 0x557   :  { %2575 = vtanh.f32 %v1392_v39 }
 0x560   :  { %v2912_v41 = vpop.eup %2573 }
 0x561   :  { %v2576_v42 = vpop.eup %2575  ;;  %2405 = vmatmul.mubr.msk.f32.vlgmr.msra.gmra.mrb[16].mxu0 %vm218_vm3, %v2912_v41 }
 0x562   :  { %2528 = vmatpush3.bf16.msra.mxu0 %v2731_v6  ;;  %2412 = vmatmul.mubr.msk.f32.vlgmr.msra.gmra.mrb[24].mxu1 %vm218_vm3, %v2576_v42 }
 0x563   :  { %2418 = vmatprep.mubr.msk.f32.mxu0 %vm2636_vm2, %v2637_v11  ;;  %2532 = vmatprep.subr.bf16.mxu0 %v2635_v8 }
 0x564   :  { %2531 = vmatpush3.bf16.msra.mxu1 %v2767_v15  ;;  %2425 = vmatprep.mubr.msk.f32.mxu1 %vm2636_vm2, %v2637_v11 }
 0x565   :  { %2419 = vmatmul.mubr.msk.f32.vlgmr.msra.gmra.mrb[18].mxu0 %vm218_vm3, %v2576_v42  ;;  %2535 = vmatprep.subr.bf16.mxu1 %v2635_v8 }
 0x566   :  { %2534 = vmatpush3.bf16.msra.mxu0 %v2779_v19  ;;  %2432 = vmatprep.mubr.msk.f32.mxu0 %vm2636_vm2, %v2637_v11 }
 0x567   :  { %2538 = vmatprep.subr.bf16.mxu0 %v2635_v8 }
 0x634   :  { %v1463_v20 = vpop.f32.mrb[16].mxu0 }
 0x635   :  { %v2406_v43 = vpop.f32.mrb[17].mxu0  ;;  %v1536_v44 = vpop.f32.mrb[24].mxu1 }
 0x636   :  { %v1537_v46 = vadd.f32 %v1536_v44, %v1463_v20  ;;  %v2413_v47 = vpop.f32.mrb[25].mxu1 }
 0x638   :  { %v1540_v49 = vadd.f32 %v2826_v36, %v1537_v46  ;;  %v1608_v50 = vpop.f32.mrb[18].mxu0 }
 0x639   :  { %v1612_v51 = vadd.f32 %v1608_v50, %v207_v48  ;;  %v2420_v52 = vpop.f32.mrb[19].mxu0 }
 0x63a   :  { %2577 = vtanh.f32 %v1540_v49 }
 0x63b   :  { %2579 = vtanh.f32 %v1612_v51 }
 0x644   :  { %v2578_v53 = vpop.eup %2577 }
 0x645   :  { %v2580_v54 = vpop.eup %2579  ;;  %2426 = vmatmul.mubr.msk.f32.vlgmr.msra.gmra.mrb[26].mxu1 %vm218_vm3, %v2578_v53 }
 0x646   :  { %2433 = vmatmul.mubr.msk.f32.vlgmr.msra.gmra.mrb[20].mxu0 %vm218_vm3, %v2580_v54  ;;  %2537 = vmatpush3.bf16.msra.mxu1 %v2731_v6  ;;  %v58_v6 = vld [vmem:[%s3041_s9] sm:$0xff] }
 0x647   :  { %2439 = vmatprep.mubr.msk.f32.mxu1 %vm2636_vm2, %v2637_v11  ;;  %2540 = vmatpush3.bf16.msra.mxu0 %v2767_v15  ;;  %v59_v15 = vld [vmem:[%s3041_s9 + $0x8] sm:$0xff] }
 0x648   :  { %2541 = vmatprep.subr.bf16.mxu1 %v2635_v8  ;;  %2446 = vmatprep.mubr.msk.f32.mxu0 %vm2636_vm2, %v2637_v11  ;;  %v2544_v26 = vpack.c.bf16 %v59_v15, %v58_v6 }
 0x649   :  { %2440 = vmatmul.mubr.msk.f32.vlgmr.msra.gmra.mrb[28].mxu1 %vm218_vm3, %v2580_v54 }
 0x64a   :  { %2543 = vmatpush3.bf16.msra.mxu1 %v2779_v19  ;;  %2453 = vmatprep.mubr.msk.f32.mxu1 %vm2636_vm2, %v2637_v11  ;;  %v208_v19 = vadd.f32 %v2798_v24, %v2796_v23 }
 0x64b   :  { %2545 = vmatprep.subr.bf16.mxu0 %v2544_v26 }
 0x718   :  { %v1683_v8 = vpop.f32.mrb[26].mxu1 }
 0x719   :  { %v1756_v55 = vpop.f32.mrb[20].mxu0  ;;  %v2427_v56 = vpop.f32.mrb[27].mxu1 }
 0x71a   :  { %v1757_v57 = vadd.f32 %v1756_v55, %v1683_v8  ;;  %v2434_v58 = vpop.f32.mrb[21].mxu0 }
 0x71c   :  { %v1760_v11 = vadd.f32 %v2826_v36, %v1757_v57  ;;  %v1828_v60 = vpop.f32.mrb[28].mxu1 }
 0x71d   :  { %v1832_v61 = vadd.f32 %v1828_v60, %v208_v19  ;;  %v2441_v62 = vpop.f32.mrb[29].mxu1 }
 0x71e   :  { %2581 = vtanh.f32 %v1760_v11 }
 0x71f   :  { %2583 = vtanh.f32 %v1832_v61 }
 0x728   :  { %v2582_v63 = vpop.eup %2581 }
 0x729   :  { %v2584_v0 = vpop.eup %2583  ;;  %2447 = vmatmul.mubr.msk.f32.vlgmr.msra.gmra.mrb[22].mxu0 %vm218_vm3, %v2582_v63 }
 0x72a   :  { %2105 = vst.msk [vmem:[#allocation2] sm:$0xff] %vm218_vm3, %v2584_v0  ;;  %2547 = vmatpush3.bf16.msra.mxu0 %v2544_v26  ;;  %2460 = vmatprep.mubr.msk.f32.mxu0 %vm218_vm3, %v2830_v45 }
 0x72b   :  { %2454 = vmatmul.mubr.msk.f32.vlgmr.msra.gmra.mrb[30].mxu1 %vm218_vm3, %v2584_v0 }
 0x72d   :  { %2461 = vmatmul.mubr.msk.f32.vlgmr.msra.gmra.mrb[24].mxu0 %vm218_vm3, %v2850_v59  ;;  %v2174_v59 = vld [vmem:[%s3042_s10] ss:$0 sm:$0xff] }
 0x72e   :  { %2463 = vmatprep.mubr.msk.f32.mxu0 %vm218_vm3, %v2870_v9 }
 0x731   :  { %2464 = vmatmul.mubr.msk.f32.gmra.mrb[26].mxu0 %vm218_vm3, %v2891_v29 }
 0x732   :  { %2466 = vmatprep.mubr.msk.f32.mxu0 %vm218_vm3, %v2912_v41 }
 0x735   :  { %2467 = vmatmul.mubr.msk.f32.gmra.mrb[28].mxu0 %vm218_vm3, %v2578_v53 }
 0x736   :  { %2469 = vmatprep.mubr.msk.f32.mxu0 %vm218_vm3, %v2582_v63 }
 0x7fc   :  { %v1903_v23 = vpop.f32.mrb[22].mxu0 }
 0x7fd   :  { %v2448_v24 = vpop.f32.mrb[23].mxu0 }
 0x7fe   :  { %v1976_v45 = vpop.f32.mrb[30].mxu1 }
 0x7ff   :  { %v1977_v1 = vadd.f32 %v1976_v45, %v1903_v23  ;;  %v2455_v2 = vpop.f32.mrb[31].mxu1 }
 0x800   :  { %v2462_v3 = vpop.f32.mrb[24].mxu0 }
 0x801   :  { %v1980_v4 = vadd.f32 %v2826_v36, %v1977_v1  ;;  %v2064_v5 = vadd.f32 %v2462_v3, %v2174_v59  ;;  %v2058_v7 = vpop.f32.mrb[25].mxu0 }
 0x802   :  { %v2059_v9 = vadd.f32 %v2174_v59, %v2058_v7 }
 0x803   :  { %2585 = vtanh.f32 %v1980_v4  ;;  %2098 = vst.msk [vmem:[%s3043_s11 + $0x8] sm:$0xff] %vm60_vm1, %v2064_v5 }
 0x804   :  { %2097 = vst.msk [vmem:[%s3043_s11] sm:$0xff] %vm60_vm1, %v2059_v9  ;;  %v2465_v10 = vpop.f32.mrb[26].mxu0 }
 0x805   :  { %v2074_v12 = vadd.f32 %v2465_v10, %v2174_v59  ;;  %v2068_v13 = vpop.f32.mrb[27].mxu0 }
 0x806   :  { %v2069_v14 = vadd.f32 %v2174_v59, %v2068_v13 }
 0x807   :  { %2100 = vst.msk [vmem:[%s3043_s11 + $0x18] sm:$0xff] %vm60_vm1, %v2074_v12 }
 0x808   :  { %2099 = vst.msk [vmem:[%s3043_s11 + $0x10] sm:$0xff] %vm60_vm1, %v2069_v14  ;;  %v2468_v36 = vpop.f32.mrb[28].mxu0 }
 0x809   :  { %v2084_v16 = vadd.f32 %v2468_v36, %v2174_v59  ;;  %v2078_v17 = vpop.f32.mrb[29].mxu0 }
 0x80a   :  { %v2079_v18 = vadd.f32 %v2174_v59, %v2078_v17 }
 0x80b   :  { %2102 = vst.msk [vmem:[%s3043_s11 + $0x28] sm:$0xff] %vm60_vm1, %v2084_v16 }
 0x80c   :  { %2101 = vst.msk [vmem:[%s3043_s11 + $0x20] sm:$0xff] %vm60_vm1, %v2079_v18 }
 0x80d   :  { %v2586_v22 = vpop.eup %2585 }
 0x80e   :  { %2106 = vst.msk [vmem:[#allocation4] sm:$0xff] %vm218_vm3, %v2586_v22  ;;  %2470 = vmatmul.mubr.msk.f32.gmra.mrb[30].mxu0 %vm218_vm3, %v2586_v22 }
 0x80f   :  { %2598 = shalt.err (!%p2595_p4)
}
 0x810   :  { %s2599_s18 = scalar_lea.hbm %s3044_s12, 128 }
 0x811   :  { %p2600_p5 = scmp.ne.s32.totalorder %s3044_s12, %s2599_s18  ;;  %p2603_p6 = scmp.lt.u32.totalorder %s2599_s18, %s3044_s12 }
 0x813   :  { %p2605_p7 = pnand %p2603_p6, %p2600_p5 }
 0x815   :  { %2608 = shalt.err (!%p2605_p7)
}
 0x816   :  { %2118 = dma.vmem_to_hbm [thread:$0]  %s2116_s3, 128, %s3044_s12, [#allocation3]  }
 0x817   :  { %s2609_s9 = scalar_lea.vmem %s2126_s6, 128  ;;  %p2614_p9 = scmp.lt.s32.totalorder %s2126_s6, %s2126_s6 }
 0x818   :  { %p2610_p8 = scmp.ne.s32.totalorder %s2126_s6, %s2609_s9  ;;  %p2615_p10 = scmp.lt.s32.totalorder %s2609_s9, %s2609_s9 }
 0x81a   :  { %p2616_p11 = por %p2615_p10, %p2614_p9 }
 0x81c   :  { %p2617_p12 = pnand %p2616_p11, %p2610_p8 }
 0x81e   :  { %2620 = shalt.err (!%p2617_p12)
}
 0x81f   :  { %s2621_s24 = scalar_lea.hbm %s3045_s13, 128 }
 0x820   :  { %p2622_p13 = scmp.ne.s32.totalorder %s3045_s13, %s2621_s24  ;;  %p2625_p0 = scmp.lt.u32.totalorder %s2621_s24, %s3045_s13 }
 0x822   :  { %p2627_p1 = pnand %p2625_p0, %p2622_p13 }
 0x824   :  { %2630 = shalt.err (!%p2627_p1)
}
 0x825   :  { %2128 = dma.vmem_to_hbm [thread:$0]  %s2126_s6, 128, %s3045_s13, [#allocation5]  }
 0x8e1   :  { %v2471_v25 = vpop.f32.mrb[30].mxu0 }
 0x8e2   :  { %v2094_v27 = vadd.f32 %v2471_v25, %v2174_v59  ;;  %v2088_v28 = vpop.f32.mrb[31].mxu0 }
 0x8e3   :  { %v2089_v29 = vadd.f32 %v2174_v59, %v2088_v28 }
 0x8e4   :  { %2104 = vst.msk [vmem:[%s3043_s11 + $0x38] sm:$0xff] %vm60_vm1, %v2094_v27 }
 0x8e5   :  { %2103 = vst.msk [vmem:[%s3043_s11 + $0x30] sm:$0xff] %vm60_vm1, %v2089_v29 }
 0x8e6   :  { %2631 = dma.done.wait [#allocation3], 128  }
 0x8e7   :  { %2632 = vsyncadd [#allocation3], 4294967168 }
 0x8e8   :  { %2633 = dma.done.wait [#allocation5], 128  }
 0x8e9   :  { %2634 = vsyncadd [#allocation5], 4294967168 }
 0x8ea   :  { %2137 = vsyncpa [#allocation3], 1 }
 0x8eb   :  { %2138 = vsyncpa [#allocation5], 1 }

</bundles_post_ra>
